<compile_context>
chip_gen: v6e
topology: v6e:2x2x1
jax: 0.10.0
libtpu: 0.0.40
codegen_flags: <defaults>
</compile_context>

<pallas_src>
import jax
import jax.numpy as jnp
from jax.experimental import pallas as pl
from jax.experimental.pallas import tpu as pltpu


def _round_up(x, m):
    return (x + m - 1) // m * m


def _vmem_budget_bytes():
    """Per-TensorCore VMEM budget with headroom for Mosaic internal scratch."""
    cap = 64 << 20
    try:
        info = pltpu.get_tpu_info()
        cap = int(getattr(info, "vmem_capacity_bytes", cap)) or cap
    except Exception:
        pass
    # Leave ~16 MiB headroom; never ask for more than ~96 MiB (v5e/v6e) and
    # never assume less than 32 MiB.
    return max(32 << 20, min(cap - (16 << 20), 96 << 20))


# ---------------------------------------------------------------------------
# Kernels
# ---------------------------------------------------------------------------
def ffn_kernel_acc(x_ref, w1_ref, b1_ref, w2_ref, b2_ref, o_ref, acc_ref):
    """Generic variant: f32 scratch accumulator, output cast at the end.

    x_ref:  (tile_m, d_model_p)      w1_ref: (d_model_p, tile_ff)
    b1_ref: (1, tile_ff)             w2_ref: (tile_ff, d_model_p)
    b2_ref: (1, d_model_p)           o_ref:  (tile_m, d_model_p)
    acc_ref: f32 (tile_m, d_model_p) scratch accumulating over d_ff chunks.
    """
    k = pl.program_id(1)

    @pl.when(k == 0)
    def _():
        # Fold b2 into the accumulator init (saves an epilogue VPU add).
        acc_ref[...] = jnp.broadcast_to(b2_ref[...], acc_ref.shape)

    # fc1 chunk + bias + ReLU (f32 math on the VPU; MXU accumulates in f32).
    h = jnp.dot(x_ref[...], w1_ref[...], preferred_element_type=jnp.float32)
    h = jnp.maximum(h + b1_ref[...], 0.0)
    # dropout: identity (eval mode).

    # fc2 partial contribution of this d_ff chunk.
    acc_ref[...] += jnp.dot(h.astype(w2_ref.dtype), w2_ref[...],
                            preferred_element_type=jnp.float32)

    @pl.when(k == pl.num_programs(1) - 1)
    def _():
        o_ref[...] = acc_ref[...].astype(o_ref.dtype)


def ffn_kernel_f32out(x_ref, w1_ref, b1_ref, w2_ref, b2_ref, o_ref):
    """f32-output variant: accumulate directly into o_ref, no scratch."""
    k = pl.program_id(1)

    @pl.when(k == 0)
    def _():
        o_ref[...] = jnp.broadcast_to(b2_ref[...], o_ref.shape)

    h = jnp.dot(x_ref[...], w1_ref[...], preferred_element_type=jnp.float32)
    h = jnp.maximum(h + b1_ref[...], 0.0)
    # dropout: identity (eval mode).
    o_ref[...] += jnp.dot(h.astype(w2_ref.dtype), w2_ref[...],
                          preferred_element_type=jnp.float32)


# ---------------------------------------------------------------------------
# Wrapper
# ---------------------------------------------------------------------------
def position_wise_ffn(x, w1, b1, w2, b2, *, tile_m=None, tile_ff=None,
                      compute_dtype=jnp.bfloat16):
    """x: (B, S, d_model); w1: (d_model, d_ff) = W1^T; w2: (d_ff, d_model) = W2^T.

    compute_dtype: dtype of the matmul inputs (default bf16 — native on all TPU
    MXUs; halves the dominant weight HBM traffic).  Pass jnp.float32 for full
    f32 matmul inputs.  Accumulation is always f32; output keeps x.dtype.
    """
    B, S, d_model = x.shape
    d_ff = w1.shape[1]
    assert w1.shape == (d_model, d_ff)
    assert w2.shape == (d_ff, d_model)
    out_dtype = x.dtype
    M = B * S

    if compute_dtype is None:
        compute_dtype = jnp.bfloat16

    x_it = jnp.dtype(compute_dtype).itemsize
    w_it = x_it
    o_it = jnp.dtype(out_dtype).itemsize
    use_acc = jnp.dtype(out_dtype) != jnp.dtype(jnp.float32)

    budget = _vmem_budget_bytes()

    # ---- alignment: lane-dense d_model, sublane-packed M, 256-aligned d_ff --
    d_model_p = _round_up(d_model, 128)          # lane-dense (unmasked) stores
    m_align = 16 if x_it < 4 else 8              # bf16 packs 16 rows / vreg
    ff_align = 256 if d_ff >= 256 else 128       # v6e/v7x MXU is 2x256^2

    def vmem_need(tm, tf):
        return (2 * tm * d_model_p * x_it            # x tile (double-buffered)
                + 2 * tm * d_model_p * o_it          # out tile
                + 2 * d_model_p * tf * w_it          # W1 slice
                + 2 * tf * d_model_p * w_it          # W2 slice
                + 4 * (tf + d_model_p) * 4           # biases
                + (tm * d_model_p * 4 if use_acc else 0)   # f32 acc scratch
                + tm * tf * 4)                       # live h intermediate

    # ---- tile_m: sized from the VMEM budget (roofline: weight bytes are
    #      re-streamed once per M tile, so bigger tile_m = higher intensity) --
    if tile_m is None:
        tile_m = 1024 if budget >= (80 << 20) else 512
    tile_m = _round_up(max(m_align, min(tile_m, _round_up(M, m_align))), m_align)

    # ---- tile_ff: weights-resident fast path when full W1/W2 fit VMEM -------
    d_ff_full = _round_up(d_ff, ff_align)
    if tile_ff is None:
        if vmem_need(tile_m, d_ff_full) <= int(budget * 0.9):
            tile_ff = d_ff_full                 # k-extent 1: weights DMA'd once
        else:
            tile_ff = min(1024, d_ff_full)
    tile_ff = _round_up(max(ff_align, min(tile_ff, d_ff_full)), ff_align)

    # ---- shrink tiles until the VMEM need fits the budget (robustness) ------
    while vmem_need(tile_m, tile_ff) > budget and (tile_m > 256 or tile_ff > ff_align):
        if tile_m > 256:
            tile_m = _round_up(max(m_align, tile_m // 2), m_align)
        else:
            tile_ff = _round_up(max(ff_align, tile_ff // 2), ff_align)

    M_p = _round_up(M, tile_m)
    d_ff_p = _round_up(d_ff, tile_ff)

    # ---- zero-pad to aligned shapes (exact: padded rows/cols contribute
    #      nothing to the retained outputs, which are sliced back below) ------
    x2d = x.reshape(M, d_model)
    if (M_p, d_model_p) != (M, d_model):
        x2d = jnp.pad(x2d, ((0, M_p - M), (0, d_model_p - d_model)))
    w1p = w1
    if (d_model_p, d_ff_p) != (d_model, d_ff):
        w1p = jnp.pad(w1, ((0, d_model_p - d_model), (0, d_ff_p - d_ff)))
    w2p = w2
    if (d_ff_p, d_model_p) != (d_ff, d_model):
        w2p = jnp.pad(w2, ((0, d_ff_p - d_ff), (0, d_model_p - d_model)))
    b1p = jnp.pad(b1, (0, d_ff_p - d_ff)).reshape(1, d_ff_p).astype(jnp.float32)
    b2p = jnp.pad(b2, (0, d_model_p - d_model)).reshape(1, d_model_p).astype(jnp.float32)

    x2d = x2d.astype(compute_dtype)
    w1p = w1p.astype(compute_dtype)
    w2p = w2p.astype(compute_dtype)

    m_tiles = M_p // tile_m
    k_tiles = d_ff_p // tile_ff
    grid = (m_tiles, k_tiles)

    # ---- compiler hints: scoped VMEM budget + (restream-aware) cost ---------
    need = vmem_need(tile_m, tile_ff)
    vmem_limit = min(need + max(need // 4, 4 << 20),
                     max(budget, need + (2 << 20)))   # always >= need

    weight_passes = 1 if k_tiles == 1 else m_tiles    # W1/W2 re-streamed per M tile
    cost = pl.CostEstimate(
        flops=4 * M_p * d_model_p * d_ff_p,
        transcendentals=0,
        bytes_accessed=(x2d.size * x_it
                        + weight_passes * (w1p.size + w2p.size) * w_it
                        + (b1p.size + b2p.size) * 4
                        + M_p * d_model_p * o_it))

    kernel = ffn_kernel_acc if use_acc else ffn_kernel_f32out
    scratch = [pltpu.VMEM((tile_m, d_model_p), jnp.float32)] if use_acc else []

    out2d = pl.pallas_call(
        kernel,
        out_shape=jax.ShapeDtypeStruct((M_p, d_model_p), out_dtype),
        grid_spec=pltpu.PrefetchScalarGridSpec(
            num_scalar_prefetch=0,
            grid=grid,
            in_specs=[
                pl.BlockSpec((tile_m, d_model_p), lambda i, k: (i, 0)),   # x rows
                pl.BlockSpec((d_model_p, tile_ff), lambda i, k: (0, k)),  # W1^T slice
                pl.BlockSpec((1, tile_ff), lambda i, k: (0, k)),          # b1 slice
                pl.BlockSpec((tile_ff, d_model_p), lambda i, k: (k, 0)),  # W2^T slice
                pl.BlockSpec((1, d_model_p), lambda i, k: (0, 0)),        # b2
            ],
            out_specs=pl.BlockSpec((tile_m, d_model_p), lambda i, k: (i, 0)),
            scratch_shapes=scratch,
        ),
        compiler_params=pltpu.CompilerParams(
            dimension_semantics=("parallel", "arbitrary"),
            vmem_limit_bytes=vmem_limit),
        cost_estimate=cost,
    )(x2d, w1p, b1p, w2p, b2p)

    return out2d[:M, :d_model].reshape(B, S, d_model)


# ---------------------------------------------------------------------------
# Test harness
# ---------------------------------------------------------------------------
def init_linear_params(key, in_features, out_features, dtype=jnp.float32):
    """Deterministic init mimicking torch.nn.Linear (kaiming-uniform-ish)."""
    kw, kb = jax.random.split(key)
    bound = 1.0 / (in_features ** 0.5)
    # Stored already transposed: (in_features, out_features) = W.T
    w = jax.random.uniform(kw, (in_features, out_features), dtype,
                           minval=-bound, maxval=bound)
    b = jax.random.uniform(kb, (out_features,), dtype,
                           minval=-bound, maxval=bound)
    return w, b


def _reference(x, w1, b1, w2, b2):
    h = jnp.maximum(x.reshape(-1, x.shape[-1]).astype(jnp.float32) @ w1 + b1, 0.0)
    return (h @ w2 + b2).reshape(x.shape[0], x.shape[1], w2.shape[1])


if __name__ == "__main__":
    # Small shapes consistent with the module; d_model kept lane-aligned (128).
    batch, seq, d_model, d_ff = 2, 8, 128, 256

    key = jax.random.PRNGKey(0)
    kx, k1, k2 = jax.random.split(key, 3)

    x = jax.random.normal(kx, (batch, seq, d_model), jnp.float32)
    w1, b1 = init_linear_params(k1, d_model, d_ff)
    w2, b2 = init_linear_params(k2, d_ff, d_model)
    ref = _reference(x, w1, b1, w2, b2)

    # Default path: bf16 MXU inputs, f32 accumulation, f32 output.
    out = jax.block_until_ready(position_wise_ffn(x, w1, b1, w2, b2))
    assert jnp.allclose(out, ref, atol=2e-1, rtol=5e-2), "default bf16 path mismatch"

    # Explicit f32 matmul inputs: tight tolerance.
    out_f32 = jax.block_until_ready(
        position_wise_ffn(x, w1, b1, w2, b2, compute_dtype=jnp.float32))
    assert jnp.allclose(out_f32, ref, atol=1e-4, rtol=1e-4), "f32 mismatch vs reference"

    # Unaligned shapes exercise the M / d_model / d_ff zero-padding path.
    x2 = jax.random.normal(kx, (2, 5, 96), jnp.float32)
    w1b, b1b = init_linear_params(k1, 96, 200)
    w2b, b2b = init_linear_params(k2, 200, 96)
    ref2 = _reference(x2, w1b, b1b, w2b, b2b)
    out2 = jax.block_until_ready(
        position_wise_ffn(x2, w1b, b1b, w2b, b2b, compute_dtype=jnp.float32))
    assert jnp.allclose(out2, ref2, atol=1e-4, rtol=1e-4), "padded-path mismatch"

    # Multi-chunk reduction (k-extent > 1) exercising the f32-output accumulator.
    w1c, b1c = init_linear_params(k1, d_model, 512)
    w2c, b2c = init_linear_params(k2, 512, d_model)
    ref3 = _reference(x, w1c, b1c, w2c, b2c)
    out3 = jax.block_until_ready(
        position_wise_ffn(x, w1c, b1c, w2c, b2c, tile_ff=256,
                          compute_dtype=jnp.float32))
    assert jnp.allclose(out3, ref3, atol=1e-4, rtol=1e-4), "multi-chunk mismatch"

    # bf16 output exercises the scratch-accumulator kernel (non-f32 output).
    out4 = jax.block_until_ready(
        position_wise_ffn(x.astype(jnp.bfloat16), w1c, b1c, w2c, b2c, tile_ff=256))
    assert jnp.allclose(out4.astype(jnp.float32), ref3, atol=2e-1, rtol=5e-2), \
        "bf16-output path mismatch"

    print("KERNEL_OK")
</pallas_src>

<mosaic_0001>
module attributes {stable_mosaic.version = 11 : i64} {
  func.func @ffn_kernel_f32out(%arg0: i32, %arg1: i32, %arg2: memref<16x128xbf16, #tpu.memory_space<vmem>>, %arg3: memref<128x256xbf16, #tpu.memory_space<vmem>>, %arg4: memref<1x256xf32, #tpu.memory_space<vmem>>, %arg5: memref<256x128xbf16, #tpu.memory_space<vmem>>, %arg6: memref<1x128xf32, #tpu.memory_space<vmem>>, %arg7: memref<16x128xf32, #tpu.memory_space<vmem>>) attributes {dimension_semantics = [#tpu.dimension_semantics<parallel>, #tpu.dimension_semantics<arbitrary>], iteration_bounds = array<i64: 1, 1>, scalar_prefetch = 0 : i64, scratch_operands = 0 : i64, tpu.core_type = #tpu.core_type<tc>, window_params = [{transform_indices = @transform_0, window_bounds = array<i64: 16, 128>}, {transform_indices = @transform_1, window_bounds = array<i64: 128, 256>}, {transform_indices = @transform_2, window_bounds = array<i64: 1, 256>}, {transform_indices = @transform_3, window_bounds = array<i64: 256, 128>}, {pipeline_mode = #tpu.pipeline_mode<synchronous>, transform_indices = @transform_4, window_bounds = array<i64: 1, 128>}, {transform_indices = @transform_5, window_bounds = array<i64: 16, 128>}]} {
    %c0_i32 = arith.constant 0 : i32
    %0 = arith.cmpi eq, %arg1, %c0_i32 : i32
    %1 = arith.extui %0 : i1 to i32
    %c0_i32_0 = arith.constant 0 : i32
    %2 = arith.cmpi ne, %1, %c0_i32_0 : i32
    scf.if %2 {
      %c0_14 = arith.constant 0 : index
      %c0_15 = arith.constant 0 : index
      %17 = vector.load %arg6[%c0_14, %c0_15] : memref<1x128xf32, #tpu.memory_space<vmem>>, vector<1x128xf32>
      %18 = vector.shape_cast %17 : vector<1x128xf32> to vector<1x128xf32>
      %19 = vector.broadcast %18 : vector<1x128xf32> to vector<16x128xf32>
      %c0_16 = arith.constant 0 : index
      %c0_17 = arith.constant 0 : index
      %20 = vector.load %arg7[%c0_16, %c0_17] : memref<16x128xf32, #tpu.memory_space<vmem>>, vector<16x128xf32>
      tpu.vector_store %arg7[%c0_16, %c0_17], %19 {strides = array<i32>} : memref<16x128xf32, #tpu.memory_space<vmem>>, vector<16x128xf32>,
    } else {
    }
    %c0 = arith.constant 0 : index
    %c0_1 = arith.constant 0 : index
    %3 = vector.load %arg2[%c0, %c0_1] : memref<16x128xbf16, #tpu.memory_space<vmem>>, vector<16x128xbf16>
    %c0_2 = arith.constant 0 : index
    %c0_3 = arith.constant 0 : index
    %4 = vector.load %arg3[%c0_2, %c0_3] : memref<128x256xbf16, #tpu.memory_space<vmem>>, vector<128x256xbf16>
    %cst = arith.constant dense<0.000000e+00> : vector<16x256xf32>
    %5 = tpu.matmul %3, %4, %cst {dimension_numbers = #tpu.dot_dimension_numbers<[1], [0], [0], [1], [0, 0, 1, 1], [], []>} : vector<16x128xbf16>, vector<128x256xbf16>, vector<16x256xf32> -> vector<16x256xf32>
    %c0_4 = arith.constant 0 : index
    %c0_5 = arith.constant 0 : index
    %6 = vector.load %arg4[%c0_4, %c0_5] : memref<1x256xf32, #tpu.memory_space<vmem>>, vector<1x256xf32>
    %7 = vector.broadcast %6 : vector<1x256xf32> to vector<16x256xf32>
    %8 = arith.addf %5, %7 : vector<16x256xf32>
    %cst_6 = arith.constant 0.000000e+00 : f32
    %9 = vector.broadcast %cst_6 : f32 to vector<16x256xf32>
    %10 = arith.maximumf %8, %9 : vector<16x256xf32>
    %c0_7 = arith.constant 0 : index
    %c0_8 = arith.constant 0 : index
    %11 = vector.load %arg7[%c0_7, %c0_8] : memref<16x128xf32, #tpu.memory_space<vmem>>, vector<16x128xf32>
    %12 = arith.truncf %10 : vector<16x256xf32> to vector<16x256xbf16>
    %c0_9 = arith.constant 0 : index
    %c0_10 = arith.constant 0 : index
    %13 = vector.load %arg5[%c0_9, %c0_10] : memref<256x128xbf16, #tpu.memory_space<vmem>>, vector<256x128xbf16>
    %cst_11 = arith.constant dense<0.000000e+00> : vector<16x128xf32>
    %14 = tpu.matmul %12, %13, %cst_11 {dimension_numbers = #tpu.dot_dimension_numbers<[1], [0], [0], [1], [0, 0, 1, 1], [], []>} : vector<16x256xbf16>, vector<256x128xbf16>, vector<16x128xf32> -> vector<16x128xf32>
    %15 = arith.addf %11, %14 : vector<16x128xf32>
    %c0_12 = arith.constant 0 : index
    %c0_13 = arith.constant 0 : index
    %16 = vector.load %arg7[%c0_12, %c0_13] : memref<16x128xf32, #tpu.memory_space<vmem>>, vector<16x128xf32>
    tpu.vector_store %arg7[%c0_12, %c0_13], %15 {strides = array<i32>} : memref<16x128xf32, #tpu.memory_space<vmem>>, vector<16x128xf32>,
    return
  }
  func.func @transform_0(%arg0: i32, %arg1: i32) -> (i32, i32) {
    %c0_i32 = arith.constant 0 : i32
    %c0_i32_0 = arith.constant 0 : i32
    return %arg0, %c0_i32 : i32, i32
  }
  func.func @transform_1(%arg0: i32, %arg1: i32) -> (i32, i32) {
    %c0_i32 = arith.constant 0 : i32
    %c0_i32_0 = arith.constant 0 : i32
    return %c0_i32, %arg1 : i32, i32
  }
  func.func @transform_2(%arg0: i32, %arg1: i32) -> (i32, i32) {
    %c0_i32 = arith.constant 0 : i32
    %c0_i32_0 = arith.constant 0 : i32
    return %c0_i32, %arg1 : i32, i32
  }
  func.func @transform_3(%arg0: i32, %arg1: i32) -> (i32, i32) {
    %c0_i32 = arith.constant 0 : i32
    %c0_i32_0 = arith.constant 0 : i32
    return %arg1, %c0_i32 : i32, i32
  }
  func.func @transform_4(%arg0: i32, %arg1: i32) -> (i32, i32) {
    %c0_i32 = arith.constant 0 : i32
    %c0_i32_0 = arith.constant 0 : i32
    %c0_i32_1 = arith.constant 0 : i32
    return %c0_i32, %c0_i32_0 : i32, i32
  }
  func.func @transform_5(%arg0: i32, %arg1: i32) -> (i32, i32) {
    %c0_i32 = arith.constant 0 : i32
    %c0_i32_0 = arith.constant 0 : i32
    return %arg0, %c0_i32 : i32, i32
  }
}

</mosaic_0001>

<bundles_post_ra>
// kernel: tpu_custom_call.1
= control target key start
LH: loop header
LB: loop body
LE: loop exit
PB: predicated region body
PF: predicated region fallthrough
CT: control target
= control target key end

     0   :  { %10 = vsyncpa [#allocation3], 0  ;;  %s689_s0 = inlined_call_operand.hbm [shape: bf16[16,128], index: 0, kind: input, shape index: {}]   ;;  %s690_s1 = inlined_call_operand.hbm [shape: bf16[128,256], index: 1, kind: input, shape index: {}]   ;;  %s691_s2 = inlined_call_operand.vmem [shape: f32[1,256], index: 2, kind: input, shape index: {}]   ;;  %s692_s3 = inlined_call_operand.hbm [shape: bf16[256,128], index: 3, kind: input, shape index: {}]   ;;  %s693_s4 = inlined_call_operand.vmem [shape: f32[1,128], index: 4, kind: input, shape index: {}]   ;;  %s694_s5 = inlined_call_operand.hbm [shape: f32[16,128], index: 5, kind: output, shape index: {}]  }
   0x1   :  { %11 = vsyncpa [#allocation6], 0 }
   0x2   :  { %12 = vsyncpa [#allocation4], 0  ;;  %s626_s18 = smov [#allocation5]  }
   0x3   :  { %s30_s19 = sshll.u32 %s626_s18, 4  ;;  %s31_s19 = int_to_ptr.vmem [resolvable:$true] %s30_s19 }
   0x4   :  { %s548_s20 = scalar_lea.vmem %s31_s19, 2048  ;;  %p553_p1 = scmp.lt.s32.totalorder %s31_s19, %s31_s19 }
   0x5   :  { %p549_p0 = scmp.ne.s32.totalorder %s31_s19, %s548_s20  ;;  %p554_p2 = scmp.lt.s32.totalorder %s548_s20, %s548_s20 }
   0x7   :  { %p555_p3 = por %p554_p2, %p553_p1 }
   0x9   :  { %p556_p4 = pnand %p555_p3, %p549_p0 }
   0xb   :  { %559 = shalt.err (!%p556_p4)
}
   0xc   :  { %s627_s21 = smov 128   ;;  %s628_s22 = smov 8  }
   0xd   :  { %36 = dma.hbm_to_vmem [thread:$0]  %s690_s1, 2048, %s31_s19, [#allocation6], %s627_s21, %s627_s21, %s628_s22  }
   0xe   :  { %s629_s25 = smov [#allocation2]  }
   0xf   :  { %s18_s26 = sshll.u32 %s629_s25, 4  ;;  %s19_s26 = int_to_ptr.vmem [resolvable:$true] %s18_s26 }
  0x10   :  { %s568_s27 = scalar_lea.vmem %s19_s26, 128  ;;  %p573_p6 = scmp.lt.s32.totalorder %s19_s26, %s19_s26 }
  0x11   :  { %p569_p5 = scmp.ne.s32.totalorder %s19_s26, %s568_s27  ;;  %p574_p7 = scmp.lt.s32.totalorder %s568_s27, %s568_s27 }
  0x13   :  { %p575_p8 = por %p574_p7, %p573_p6 }
  0x15   :  { %p576_p9 = pnand %p575_p8, %p569_p5 }
  0x17   :  { %579 = shalt.err (!%p576_p9)
}
  0x18   :  { %s630_s28 = smov 64   ;;  %s631_s29 = smov 4  }
  0x19   :  { %24 = dma.hbm_to_vmem [thread:$0]  %s689_s0, 128, %s19_s26, [#allocation3], %s630_s28, %s630_s28, %s631_s29  }
  0x1a   :  { %s632_s7 = smov [#allocation7]  }
  0x1b   :  { %s44_s8 = sshll.u32 %s632_s7, 4  ;;  %s45_s8 = int_to_ptr.vmem [resolvable:$true] %s44_s8 }
  0x1c   :  { %s588_s1 = scalar_lea.vmem %s45_s8, 2048  ;;  %p593_p11 = scmp.lt.s32.totalorder %s45_s8, %s45_s8 }
  0x1d   :  { %p589_p10 = scmp.ne.s32.totalorder %s45_s8, %s588_s1  ;;  %p594_p12 = scmp.lt.s32.totalorder %s588_s1, %s588_s1 }
  0x1f   :  { %p595_p13 = por %p594_p12, %p593_p11 }
  0x21   :  { %p596_p0 = pnand %p595_p13, %p589_p10 }
  0x23   :  { %599 = shalt.err (!%p596_p0)
}
  0x24   :  { %50 = dma.hbm_to_vmem [thread:$0]  %s692_s3, 2048, %s45_s8, [#allocation6], %s630_s28, %s630_s28, %s631_s29  }
  0x25   :  { %620 = dma.done.wait [#allocation3], 128  }
  0x26   :  { %621 = vsyncadd [#allocation3], 4294967168 }
  0x27   :  { %622 = dma.done.wait [#allocation6], 4096  }
  0x28   :  { %623 = vsyncadd [#allocation6], 4294963200  ;;  %v633_v0 = vmov 0   ;;  %v499_v1 = vld [vmem:[#allocation5 + $0x74] ss:$8 sps:$4 sm:$0xff]   ;;  %v528_v16 = vld [vmem:[#allocation7 + $0x68] sm:$0xff]   ;;  %v96_v34 = vlaneseq }
  0x29   :  { %224 = vmatprep.mubr.bf16.mxu0 %v633_v0  ;;  %v501_v2 = vld [vmem:[#allocation5 + $0x70] ss:$8 sps:$4 sm:$0xff]   ;;  %192 = vmatprep.subr.bf16.mxu0 %v499_v1  ;;  %v502_v3 = vld [vmem:[#allocation5 + $0x64] ss:$8 sps:$4 sm:$0xff]   ;;  %v504_v4 = vld [vmem:[#allocation5 + $0x60] ss:$8 sps:$4 sm:$0xff]  }
  0x2a   :  { %193 = vmatpush1.bf16.msra.mxu0 %v501_v2  ;;  %v505_v5 = vld [vmem:[#allocation5 + $0x54] ss:$8 sps:$4 sm:$0xff]   ;;  %v507_v6 = vld [vmem:[#allocation5 + $0x50] ss:$8 sps:$4 sm:$0xff]   ;;  %v508_v7 = vld [vmem:[#allocation5 + $0x44] ss:$8 sps:$4 sm:$0xff]  }
  0x2b   :  { %194 = vmatprep.subr.bf16.mxu0 %v502_v3  ;;  %v510_v8 = vld [vmem:[#allocation5 + $0x40] ss:$8 sps:$4 sm:$0xff]   ;;  %v511_v9 = vld [vmem:[#allocation5 + $0x34] ss:$8 sps:$4 sm:$0xff]   ;;  %v513_v11 = vld [vmem:[#allocation5 + $0x30] ss:$8 sps:$4 sm:$0xff]  }
  0x2c   :  { %v524_v10 = vld [vmem:[#allocation7 + $0x78] sm:$0xff]   ;;  %v514_v13 = vld [vmem:[#allocation5 + $0x24] ss:$8 sps:$4 sm:$0xff]   ;;  %v526_v14 = vld [vmem:[#allocation7 + $0x70] sm:$0xff]   ;;  %v97_v35 = vshrl.u32 %v96_v34, 7  ;;  %s634_s12 = smov [#allocation8]  }
  0x2d   :  { %v525_v12 = vld [vmem:[#allocation7 + $0x38] sm:$0xff]   ;;  %468 = vmatprep.subr.bf16.mxu1 %v524_v10  ;;  %v527_v15 = vld [vmem:[#allocation7 + $0x30] sm:$0xff]   ;;  %v516_v17 = vld [vmem:[#allocation5 + $0x20] ss:$8 sps:$4 sm:$0xff]   ;;  %s421_s13 = sshll.u32 %s634_s12, 4  ;;  %s422_s13 = int_to_ptr.vmem [resolvable:$true] %s421_s13 }
  0x2e   :  { %195 = vmatpush1.bf16.msra.mxu0 %v504_v4  ;;  %469 = vmatpush3.bf16.msra.mxu1 %v525_v12  ;;  %v517_v18 = vld [vmem:[#allocation5 + $0x14] ss:$8 sps:$4 sm:$0xff]   ;;  %v529_v19 = vld [vmem:[#allocation7 + $0x28] sm:$0xff]   ;;  %v530_v20 = vld [vmem:[#allocation7 + $0x60] sm:$0xff]   ;;  %v102_v36 = vsub.s32 1, %v97_v35  ;;  %v98_v37 = vsub.s32 0, %v97_v35  ;;  %p605_p2 = scmp.lt.s32.totalorder %s422_s13, %s422_s13 }
  0x2f   :  { %196 = vmatprep.subr.bf16.mxu0 %v505_v5  ;;  %470 = vmatprep.subr.bf16.mxu1 %v526_v14  ;;  %v519_v21 = vld [vmem:[#allocation5 + $0x10] ss:$8 sps:$4 sm:$0xff]   ;;  %v531_v22 = vld [vmem:[#allocation7 + $0x20] sm:$0xff]   ;;  %v536_v30 = vld [vmem:[#allocation7 + $0x48] sm:$0xff]   ;;  %s600_s14 = scalar_lea.vmem %s422_s13, 256 }
  0x30   :  { %v520_v23 = vld [vmem:[#allocation5 + $0x4] ss:$8 sps:$4 sm:$0xff]   ;;  %v532_v24 = vld [vmem:[#allocation7 + $0x58] sm:$0xff]   ;;  %v522_v25 = vld [vmem:[#allocation5] ss:$8 sps:$4 sm:$0xff]   ;;  %p601_p1 = scmp.ne.s32.totalorder %s422_s13, %s600_s14  ;;  %p606_p3 = scmp.lt.s32.totalorder %s600_s14, %s600_s14 }
  0x31   :  { %v533_v26 = vld [vmem:[#allocation7 + $0x18] sm:$0xff]   ;;  %v534_v28 = vld [vmem:[#allocation7 + $0x50] sm:$0xff]   ;;  %v537_v31 = vld [vmem:[#allocation7 + $0x8] sm:$0xff]  }
  0x32   :  { %197 = vmatpush1.bf16.msra.mxu0 %v507_v6  ;;  %471 = vmatpush3.bf16.msra.mxu1 %v527_v15  ;;  %v523_v27 = vld [vmem:[#allocation2] sm:$0xff]   ;;  %v535_v29 = vld [vmem:[#allocation7 + $0x10] sm:$0xff]   ;;  %v538_v32 = vld [vmem:[#allocation7 + $0x40] sm:$0xff]   ;;  %p607_p4 = por %p606_p3, %p605_p2 }
  0x33   :  { %198 = vmatprep.subr.bf16.mxu0 %v508_v7  ;;  %472 = vmatprep.subr.bf16.mxu1 %v528_v16  ;;  %v539_v33 = vld [vmem:[#allocation7] sm:$0xff]   ;;  %v94_v38 = vld [vmem:[%s691_s2] sm:$0x3] }
  0x34   :  { %v103_v40 = vrot.slane %v94_v38, %v102_v36  ;;  %v99_v41 = vrot.slane %v94_v38, %v98_v37  ;;  %v434_v56 = vld [vmem:[%s693_s4] ss:$0 sm:$0xff]  ;;  %p608_p5 = pnand %p607_p4, %p601_p1 }
  0x36   :  { %199 = vmatpush1.bf16.msra.mxu0 %v510_v8  ;;  %473 = vmatpush3.bf16.msra.mxu1 %v529_v19 }
  0x37   :  { %200 = vmatprep.subr.bf16.mxu0 %v511_v9  ;;  %474 = vmatprep.subr.bf16.mxu1 %v530_v20 }
  0x3a   :  { %201 = vmatpush1.bf16.msra.mxu0 %v513_v11  ;;  %475 = vmatpush3.bf16.msra.mxu1 %v531_v22 }
  0x3b   :  { %202 = vmatprep.subr.bf16.mxu0 %v514_v13  ;;  %476 = vmatprep.subr.bf16.mxu1 %v532_v24 }
  0x3e   :  { %203 = vmatpush1.bf16.msra.mxu0 %v516_v17  ;;  %477 = vmatpush3.bf16.msra.mxu1 %v533_v26 }
  0x3f   :  { %204 = vmatprep.subr.bf16.mxu0 %v517_v18  ;;  %478 = vmatprep.subr.bf16.mxu1 %v534_v28 }
  0x42   :  { %205 = vmatpush1.bf16.msra.mxu0 %v519_v21  ;;  %479 = vmatpush3.bf16.msra.mxu1 %v535_v29 }
  0x43   :  { %206 = vmatprep.subr.bf16.mxu0 %v520_v23  ;;  %480 = vmatprep.subr.bf16.mxu1 %v536_v30 }
  0x46   :  { %207 = vmatpush1.bf16.msra.mxu0 %v522_v25  ;;  %481 = vmatpush3.bf16.msra.mxu1 %v537_v31 }
  0x47   :  { %482 = vmatprep.subr.bf16.mxu1 %v538_v32 }
  0x49   :  { %225 = vmatmul.mubr.bf16.vlgmr.msra.gmra.mxu0 %v523_v27 }
  0x4a   :  { %483 = vmatpush3.bf16.msra.mxu1 %v539_v33 }
 0x109   :  { %v226_v39 = vpop.f32.mrf.mxu0 }
 0x10a   :  { %v227_v46 = vadd.f32 %v226_v39, %v99_v41 }
 0x10b   :  { %v228_v42 = vpop.f32.mrf.mxu0 }
 0x10c   :  { %v229_v44 = vadd.f32 %v228_v42, %v103_v40  ;;  %v235_v52 = vmax.f32 %v227_v46, 0.0 }
 0x10d   :  { %v230_v43 = vpop.f32.mrf.mxu0 }
 0x10e   :  { %v231_v45 = vadd.f32 %v230_v43, %v99_v41  ;;  %v236_v50 = vmax.f32 %v229_v44, 0.0 }
 0x10f   :  { %v232_v47 = vpop.f32.mrf.mxu0 }
 0x110   :  { %v233_v48 = vadd.f32 %v232_v47, %v103_v40  ;;  %v237_v49 = vmax.f32 %v231_v45, 0.0 }
 0x112   :  { %v238_v51 = vmax.f32 %v233_v48, 0.0  ;;  %v241_v54 = vpack.c.bf16 %v237_v49, %v235_v52 }
 0x114   :  { %v242_v53 = vpack.c.bf16 %v238_v51, %v236_v50 }
 0x116   :  { %403 = vmatprep.mubr.bf16.mxu1 %v242_v53 }
 0x117   :  { %404 = vmatmul.mubr.bf16.vlgmr.msra.gmra.mxu1 %v241_v54 }
 0x1d7   :  { %v484_v55 = vpop.f32.mrf.mxu1 }
 0x1d9   :  { %v485_v57 = vpop.f32.mrf.mxu1 }
 0x1da   :  { %v486_v58 = vadd.f32 %v485_v57, %v484_v55 }
 0x1db   :  { %v487_v59 = vpop.f32.mrf.mxu1 }
 0x1dc   :  { %v412_v60 = vadd.f32 %v486_v58, %v434_v56 }
 0x1dd   :  { %v488_v61 = vpop.f32.mrf.mxu1 }
 0x1de   :  { %414 = vst [vmem:[#allocation8] sm:$0xff] %v412_v60  ;;  %v489_v62 = vadd.f32 %v488_v61, %v487_v59 }
 0x1e0   :  { %v413_v63 = vadd.f32 %v489_v62, %v434_v56 }
 0x1e2   :  { %415 = vst [vmem:[#allocation8 + $0x8] sm:$0xff] %v413_v63 }
 0x1e3   :  { %611 = shalt.err (!%p608_p5)
}
 0x1e4   :  { %427 = dma.vmem_to_hbm [thread:$0]  %s422_s13, 256, %s694_s5, [#allocation4], %s627_s21, %s627_s21, %s628_s22  }
 0x1e5   :  { %624 = dma.done.wait [#allocation4], 256  }
 0x1e6   :  { %625 = vsyncadd [#allocation4], 4294967040 }
 0x1e7   :  { %431 = vsyncpa [#allocation3], 1 }
 0x1e8   :  { %432 = vsyncpa [#allocation6], 1 }
 0x1e9   :  { %433 = vsyncpa [#allocation4], 1 }

</bundles_post_ra>
